<compile_context>
chip_gen: v7x
topology: tpu7x:2x2x1
jax: 0.10.0
libtpu: 0.0.40
codegen_flags: <defaults>
</compile_context>

<pallas_src>
import jax
import jax.numpy as jnp
from jax.experimental import pallas as pl
from jax.experimental.pallas import tpu as pltpu


def _round_up(x, m):
    return ((x + m - 1) // m) * m


def _vmem_limit_bytes():
    """Generation-aware scoped-VMEM limit: 3/4 of physical VMEM, capped at 96 MiB."""
    try:
        cap = pltpu.get_tpu_info().vmem_capacity_bytes
        return int(min(cap * 3 // 4, 96 * 1024 * 1024))
    except Exception:  # conservative fallback: safe on v5e/v6e/v7x
        return 48 * 1024 * 1024


def _choose_node_tiling(n, tile_target=1024):
    """Pick (node_tile, n_pad).

    node_tile is a multiple of 128 (or of 8 for tiny graphs), divides n_pad,
    is capped at `tile_target`, and leaves >=2 row tiles when the graph is big
    enough (so the "parallel" row axis can shard across v7x's two TensorCores).
    Padding is only to the next multiple of 128: adjacency HBM bytes are
    quadratic in n_pad, so small padding beats slightly bigger tiles.
    """
    if n <= 256:
        t = _round_up(max(n, 8), 8)
        return t, t
    n_pad = _round_up(n, 128)
    blocks = n_pad // 128
    max_blk = max(1, min(tile_target // 128, blocks // 2))
    tile_blk = 1
    for cand in range(max_blk, 0, -1):      # largest divisor of `blocks` <= max_blk
        if blocks % cand == 0:
            tile_blk = cand
            break
    return tile_blk * 128, n_pad


# ---------------------------------------------------------------------------
# Pallas kernel: tiled matmul with fused bias / ReLU / next-layer X@W epilogue.
# ---------------------------------------------------------------------------
def _make_mm_kernel(*, has_bias, apply_relu, fuse_next, use_scratch):
    def kernel(*refs):
        idx = 0
        a_ref = refs[idx]; idx += 1
        b_ref = refs[idx]; idx += 1
        bias_ref = None
        if has_bias:
            bias_ref = refs[idx]; idx += 1
        wnext_ref = None
        if fuse_next:
            wnext_ref = refs[idx]; idx += 1
        o_ref = refs[idx]; idx += 1
        # f32 output block is k-invariant -> accumulate directly into it.
        acc_ref = refs[idx] if use_scratch else o_ref

        k = pl.program_id(1)

        @pl.when(k == 0)
        def _():
            acc_ref[...] = jnp.zeros_like(acc_ref)

        acc_ref[...] += jnp.dot(a_ref[...], b_ref[...],
                                preferred_element_type=jnp.float32)

        @pl.when(k == pl.num_programs(1) - 1)
        def _():
            r = acc_ref[...]
            if has_bias:
                r = r + bias_ref[...]                  # (tm, F) + (1, F)
            if apply_relu:
                r = jnp.maximum(r, 0.0)
            if fuse_next:                              # fused next-layer X @ W
                r = jnp.dot(r.astype(wnext_ref.dtype), wnext_ref[...],
                            preferred_element_type=jnp.float32)
            o_ref[...] = r.astype(o_ref.dtype)

    return kernel


def matmul_fused(a, b, bias=None, w_next=None, *, apply_relu=False,
                 out_dtype=jnp.float32, tm, tk, vmem_limit):
    """relu?(a @ b + bias) [@ w_next] on the MXU.

    a: [M, K], b: [K, F], bias: [1, F] f32 or None, w_next: [F, F2] bf16 or None.
    Operands must already be padded (M % tm == 0, K % tk == 0) and cast to their
    compute dtypes.  Output is [M, F2 or F] in `out_dtype`.
    """
    M, K = a.shape
    K2, F = b.shape
    assert K == K2 and M % tm == 0 and K % tk == 0
    has_bias = bias is not None
    fuse_next = w_next is not None
    if has_bias:
        assert bias.shape == (1, F)
    if fuse_next:
        assert w_next.shape[0] == F
    n_out = w_next.shape[1] if fuse_next else F
    use_scratch = fuse_next or (out_dtype != jnp.float32)

    grid = (M // tm, K // tk)

    in_specs = [
        pl.BlockSpec((tm, tk), lambda i, k: (i, k)),
        pl.BlockSpec((tk, F), lambda i, k: (k, 0)),
    ]
    args = [a, b]
    if has_bias:
        in_specs.append(pl.BlockSpec((1, F), lambda i, k: (0, 0)))
        args.append(bias)
    if fuse_next:
        in_specs.append(pl.BlockSpec((F, n_out), lambda i, k: (0, 0)))
        args.append(w_next)

    scratch = [pltpu.VMEM((tm, F), jnp.float32)] if use_scratch else []

    kernel = _make_mm_kernel(has_bias=has_bias, apply_relu=apply_relu,
                             fuse_next=fuse_next, use_scratch=use_scratch)

    return pl.pallas_call(
        kernel,
        out_shape=jax.ShapeDtypeStruct((M, n_out), out_dtype),
        grid_spec=pltpu.PrefetchScalarGridSpec(
            num_scalar_prefetch=0,
            grid=grid,
            in_specs=in_specs,
            out_specs=pl.BlockSpec((tm, n_out), lambda i, k: (i, 0)),
            scratch_shapes=scratch,
        ),
        compiler_params=pltpu.CompilerParams(
            dimension_semantics=("parallel", "arbitrary"),
            vmem_limit_bytes=vmem_limit),
    )(*args)


# ---------------------------------------------------------------------------
# GCN forward (eval mode): stack of GCNConv(normalize=False) layers.
# ---------------------------------------------------------------------------
def gcn_forward(x, adj_t, weights, biases, *, lane=128, tile_target=1024):
    """adj_t is the dense, pre-normalized adjacency D^-1/2 (A+I) D^-1/2.

    Intended to be wrapped in jax.jit so the one-time pad/cast glue fuses.
    """
    num_layers = len(weights)
    n, in_channels = x.shape
    out_channels = weights[-1].shape[1]
    vmem_limit = _vmem_limit_bytes()

    # ---- one-time node tiling + pad/cast of adjacency and features ----------
    tile_n, n_pad = _choose_node_tiling(n, tile_target)
    x_p = x.astype(jnp.bfloat16)
    adj_p = adj_t.astype(jnp.bfloat16)
    if n_pad != n:
        pad = n_pad - n
        x_p = jnp.pad(x_p, ((0, pad), (0, 0)))
        adj_p = jnp.pad(adj_p, ((0, pad), (0, pad)))

    # ---- one-time pad/cast of parameters (lane-dense feature dims) ----------
    w_p, b_p = [], []
    prev_pad = in_channels            # first layer's input features stay as-is
    for l in range(num_layers):
        f_in, f_out = weights[l].shape
        f_out_pad = _round_up(f_out, lane)
        w = jnp.zeros((prev_pad, f_out_pad), jnp.bfloat16)
        w = w.at[:f_in, :f_out].set(weights[l].astype(jnp.bfloat16))
        b = jnp.zeros((1, f_out_pad), jnp.float32).at[0, :f_out].set(biases[l])
        w_p.append(w)
        b_p.append(b)
        prev_pad = f_out_pad

    # ---- layer stack ---------------------------------------------------------
    # First layer's linear transform is standalone; every subsequent X@W is
    # fused into the previous propagation's final-k epilogue.
    if in_channels > 1024 and in_channels % 1024 == 0:
        tk0 = 1024
    else:
        tk0 = in_channels
    xw = matmul_fused(x_p, w_p[0], out_dtype=jnp.bfloat16,
                      tm=tile_n, tk=tk0, vmem_limit=vmem_limit)

    out = None
    for l in range(num_layers):
        is_last = l == num_layers - 1
        if not is_last:
            # h = relu(A_hat @ xw + b_l); xw <- h @ W_{l+1}   (fused epilogue)
            # F.dropout(training=False) is the identity -> nothing else to do.
            xw = matmul_fused(adj_p, xw, bias=b_p[l], w_next=w_p[l + 1],
                              apply_relu=True, out_dtype=jnp.bfloat16,
                              tm=tile_n, tk=tile_n, vmem_limit=vmem_limit)
        else:
            out = matmul_fused(adj_p, xw, bias=b_p[l],
                               apply_relu=False, out_dtype=jnp.float32,
                               tm=tile_n, tk=tile_n, vmem_limit=vmem_limit)

    return out[:n, :out_channels]


def glorot(key, shape):
    fan_in, fan_out = shape
    limit = jnp.sqrt(6.0 / (fan_in + fan_out))
    return jax.random.uniform(key, shape, jnp.float32, -limit, limit)


if __name__ == "__main__":
    # Small, deterministic example; node count deliberately NOT a multiple of
    # 128 to exercise the padding path.
    num_nodes = 200
    in_channels = 32
    hidden_channels = 64
    out_channels = 16
    num_layers = 3
    dropout = 0.5  # unused in eval mode

    root = jax.random.PRNGKey(0)
    k_x, k_adj, k_w, k_b = jax.random.split(root, 4)

    # Node features.
    x = jax.random.normal(k_x, (num_nodes, in_channels), jnp.float32)

    # Random symmetric adjacency with self loops, then GCN normalization
    # (done outside the module in the reference script -> plain JAX glue).
    a = (jax.random.uniform(k_adj, (num_nodes, num_nodes)) < 0.1).astype(jnp.float32)
    a = jnp.maximum(a, a.T)
    a = jnp.maximum(a, jnp.eye(num_nodes, dtype=jnp.float32))
    deg = a.sum(axis=1)
    deg_inv_sqrt = 1.0 / jnp.sqrt(deg)   # self-loops guarantee deg >= 1
    adj_t = deg_inv_sqrt[:, None] * a * deg_inv_sqrt[None, :]

    # Parameters: Glorot weights, small random biases (PyG GCNConv shapes).
    dims = [in_channels] + [hidden_channels] * (num_layers - 1) + [out_channels]
    wkeys = jax.random.split(k_w, num_layers)
    bkeys = jax.random.split(k_b, num_layers)
    weights, biases = [], []
    for l in range(num_layers):
        weights.append(glorot(wkeys[l], (dims[l], dims[l + 1])))
        biases.append(0.1 * jax.random.normal(bkeys[l], (dims[l + 1],), jnp.float32))

    fwd = jax.jit(gcn_forward)
    out = jax.block_until_ready(fwd(x, adj_t, weights, biases))
    assert out.shape == (num_nodes, out_channels)

    # Matched-precision reference (bf16 MXU inputs, f32 accumulation), pure JAX.
    ref = x.astype(jnp.bfloat16)
    for l in range(num_layers):
        xw = jnp.dot(ref, weights[l].astype(jnp.bfloat16),
                     preferred_element_type=jnp.float32).astype(jnp.bfloat16)
        h = jnp.dot(adj_t.astype(jnp.bfloat16), xw,
                    preferred_element_type=jnp.float32) + biases[l]
        if l != num_layers - 1:
            ref = jnp.maximum(h, 0.0).astype(jnp.bfloat16)
        else:
            ref = h
    ref = ref.astype(jnp.float32)

    assert jnp.allclose(out.astype(jnp.float32), ref, atol=2e-2, rtol=2e-2), (
        "max abs diff", float(jnp.max(jnp.abs(out.astype(jnp.float32) - ref))))

    print("KERNEL_OK")
</pallas_src>

<mosaic_0001>
module attributes {stable_mosaic.version = 11 : i64} {
  func.func @kernel(%arg0: i32, %arg1: i32, %arg2: memref<200x32xbf16, #tpu.memory_space<vmem>>, %arg3: memref<32x128xbf16, #tpu.memory_space<vmem>>, %arg4: memref<200x128xbf16, #tpu.memory_space<vmem>>, %arg5: memref<200x128xf32, #tpu.memory_space<vmem>>) attributes {dimension_semantics = [#tpu.dimension_semantics<parallel>, #tpu.dimension_semantics<arbitrary>], iteration_bounds = array<i64: 1, 1>, scalar_prefetch = 0 : i64, scratch_operands = 1 : i64, tpu.core_type = #tpu.core_type<tc>, window_params = [{transform_indices = @transform_0, window_bounds = array<i64: 200, 32>}, {transform_indices = @transform_1, window_bounds = array<i64: 32, 128>}, {transform_indices = @transform_2, window_bounds = array<i64: 200, 128>}]} {
    %c0_i32 = arith.constant 0 : i32
    %0 = arith.cmpi eq, %arg1, %c0_i32 : i32
    %1 = arith.extui %0 : i1 to i32
    %c0_i32_0 = arith.constant 0 : i32
    %2 = arith.cmpi ne, %1, %c0_i32_0 : i32
    scf.if %2 {
      %cst_10 = arith.constant 0.000000e+00 : f32
      %12 = vector.broadcast %cst_10 : f32 to vector<200x128xf32>
      %c0_11 = arith.constant 0 : index
      %c0_12 = arith.constant 0 : index
      %13 = vector.load %arg5[%c0_11, %c0_12] : memref<200x128xf32, #tpu.memory_space<vmem>>, vector<200x128xf32>
      tpu.vector_store %arg5[%c0_11, %c0_12], %12 {strides = array<i32>} : memref<200x128xf32, #tpu.memory_space<vmem>>, vector<200x128xf32>,
    } else {
    }
    %c0 = arith.constant 0 : index
    %c0_1 = arith.constant 0 : index
    %3 = vector.load %arg5[%c0, %c0_1] : memref<200x128xf32, #tpu.memory_space<vmem>>, vector<200x128xf32>
    %c0_2 = arith.constant 0 : index
    %c0_3 = arith.constant 0 : index
    %4 = vector.load %arg2[%c0_2, %c0_3] : memref<200x32xbf16, #tpu.memory_space<vmem>>, vector<200x32xbf16>
    %c0_4 = arith.constant 0 : index
    %c0_5 = arith.constant 0 : index
    %5 = vector.load %arg3[%c0_4, %c0_5] : memref<32x128xbf16, #tpu.memory_space<vmem>>, vector<32x128xbf16>
    %cst = arith.constant dense<0.000000e+00> : vector<200x128xf32>
    %6 = tpu.matmul %4, %5, %cst {dimension_numbers = #tpu.dot_dimension_numbers<[1], [0], [0], [1], [0, 0, 1, 1], [], []>} : vector<200x32xbf16>, vector<32x128xbf16>, vector<200x128xf32> -> vector<200x128xf32>
    %7 = arith.addf %3, %6 : vector<200x128xf32>
    %c0_6 = arith.constant 0 : index
    %c0_7 = arith.constant 0 : index
    %8 = vector.load %arg5[%c0_6, %c0_7] : memref<200x128xf32, #tpu.memory_space<vmem>>, vector<200x128xf32>
    tpu.vector_store %arg5[%c0_6, %c0_7], %7 {strides = array<i32>} : memref<200x128xf32, #tpu.memory_space<vmem>>, vector<200x128xf32>,
    %c0_i32_8 = arith.constant 0 : i32
    %9 = arith.cmpi eq, %arg1, %c0_i32_8 : i32
    %10 = arith.extui %9 : i1 to i32
    %c0_i32_9 = arith.constant 0 : i32
    %11 = arith.cmpi ne, %10, %c0_i32_9 : i32
    scf.if %11 {
      %c0_10 = arith.constant 0 : index
      %c0_11 = arith.constant 0 : index
      %12 = vector.load %arg5[%c0_10, %c0_11] : memref<200x128xf32, #tpu.memory_space<vmem>>, vector<200x128xf32>
      %13 = arith.truncf %12 : vector<200x128xf32> to vector<200x128xbf16>
      %c0_12 = arith.constant 0 : index
      %c0_13 = arith.constant 0 : index
      %14 = vector.load %arg4[%c0_12, %c0_13] : memref<200x128xbf16, #tpu.memory_space<vmem>>, vector<200x128xbf16>
      tpu.vector_store %arg4[%c0_12, %c0_13], %13 {strides = array<i32>} : memref<200x128xbf16, #tpu.memory_space<vmem>>, vector<200x128xbf16>,
    } else {
    }
    return
  }
  func.func @transform_0(%arg0: i32, %arg1: i32) -> (i32, i32) {
    %c0_i32 = arith.constant 0 : i32
    return %arg0, %arg1 : i32, i32
  }
  func.func @transform_1(%arg0: i32, %arg1: i32) -> (i32, i32) {
    %c0_i32 = arith.constant 0 : i32
    %c0_i32_0 = arith.constant 0 : i32
    return %arg1, %c0_i32 : i32, i32
  }
  func.func @transform_2(%arg0: i32, %arg1: i32) -> (i32, i32) {
    %c0_i32 = arith.constant 0 : i32
    %c0_i32_0 = arith.constant 0 : i32
    return %arg0, %c0_i32 : i32, i32
  }
}

module attributes {stable_mosaic.version = 11 : i64} {
  func.func @kernel(%arg0: i32, %arg1: i32, %arg2: memref<200x200xbf16, #tpu.memory_space<vmem>>, %arg3: memref<200x128xbf16, #tpu.memory_space<vmem>>, %arg4: memref<1x128xf32, #tpu.memory_space<vmem>>, %arg5: memref<128x128xbf16, #tpu.memory_space<vmem>>, %arg6: memref<200x128xbf16, #tpu.memory_space<vmem>>, %arg7: memref<200x128xf32, #tpu.memory_space<vmem>>) attributes {dimension_semantics = [#tpu.dimension_semantics<parallel>, #tpu.dimension_semantics<arbitrary>], iteration_bounds = array<i64: 1, 1>, scalar_prefetch = 0 : i64, scratch_operands = 1 : i64, tpu.core_type = #tpu.core_type<tc>, window_params = [{transform_indices = @transform_0, window_bounds = array<i64: 200, 200>}, {transform_indices = @transform_1, window_bounds = array<i64: 200, 128>}, {pipeline_mode = #tpu.pipeline_mode<synchronous>, transform_indices = @transform_2, window_bounds = array<i64: 1, 128>}, {pipeline_mode = #tpu.pipeline_mode<synchronous>, transform_indices = @transform_3, window_bounds = array<i64: 128, 128>}, {transform_indices = @transform_4, window_bounds = array<i64: 200, 128>}]} {
    %c0_i32 = arith.constant 0 : i32
    %0 = arith.cmpi eq, %arg1, %c0_i32 : i32
    %1 = arith.extui %0 : i1 to i32
    %c0_i32_0 = arith.constant 0 : i32
    %2 = arith.cmpi ne, %1, %c0_i32_0 : i32
    scf.if %2 {
      %cst_10 = arith.constant 0.000000e+00 : f32
      %12 = vector.broadcast %cst_10 : f32 to vector<200x128xf32>
      %c0_11 = arith.constant 0 : index
      %c0_12 = arith.constant 0 : index
      %13 = vector.load %arg7[%c0_11, %c0_12] : memref<200x128xf32, #tpu.memory_space<vmem>>, vector<200x128xf32>
      tpu.vector_store %arg7[%c0_11, %c0_12], %12 {strides = array<i32>} : memref<200x128xf32, #tpu.memory_space<vmem>>, vector<200x128xf32>,
    } else {
    }
    %c0 = arith.constant 0 : index
    %c0_1 = arith.constant 0 : index
    %3 = vector.load %arg7[%c0, %c0_1] : memref<200x128xf32, #tpu.memory_space<vmem>>, vector<200x128xf32>
    %c0_2 = arith.constant 0 : index
    %c0_3 = arith.constant 0 : index
    %4 = vector.load %arg2[%c0_2, %c0_3] : memref<200x200xbf16, #tpu.memory_space<vmem>>, vector<200x200xbf16>
    %c0_4 = arith.constant 0 : index
    %c0_5 = arith.constant 0 : index
    %5 = vector.load %arg3[%c0_4, %c0_5] : memref<200x128xbf16, #tpu.memory_space<vmem>>, vector<200x128xbf16>
    %cst = arith.constant dense<0.000000e+00> : vector<200x128xf32>
    %6 = tpu.matmul %4, %5, %cst {dimension_numbers = #tpu.dot_dimension_numbers<[1], [0], [0], [1], [0, 0, 1, 1], [], []>} : vector<200x200xbf16>, vector<200x128xbf16>, vector<200x128xf32> -> vector<200x128xf32>
    %7 = arith.addf %3, %6 : vector<200x128xf32>
    %c0_6 = arith.constant 0 : index
    %c0_7 = arith.constant 0 : index
    %8 = vector.load %arg7[%c0_6, %c0_7] : memref<200x128xf32, #tpu.memory_space<vmem>>, vector<200x128xf32>
    tpu.vector_store %arg7[%c0_6, %c0_7], %7 {strides = array<i32>} : memref<200x128xf32, #tpu.memory_space<vmem>>, vector<200x128xf32>,
    %c0_i32_8 = arith.constant 0 : i32
    %9 = arith.cmpi eq, %arg1, %c0_i32_8 : i32
    %10 = arith.extui %9 : i1 to i32
    %c0_i32_9 = arith.constant 0 : i32
    %11 = arith.cmpi ne, %10, %c0_i32_9 : i32
    scf.if %11 {
      %c0_10 = arith.constant 0 : index
      %c0_11 = arith.constant 0 : index
      %12 = vector.load %arg7[%c0_10, %c0_11] : memref<200x128xf32, #tpu.memory_space<vmem>>, vector<200x128xf32>
      %c0_12 = arith.constant 0 : index
      %c0_13 = arith.constant 0 : index
      %13 = vector.load %arg4[%c0_12, %c0_13] : memref<1x128xf32, #tpu.memory_space<vmem>>, vector<1x128xf32>
      %14 = vector.broadcast %13 : vector<1x128xf32> to vector<200x128xf32>
      %15 = arith.addf %12, %14 : vector<200x128xf32>
      %cst_14 = arith.constant 0.000000e+00 : f32
      %16 = vector.broadcast %cst_14 : f32 to vector<200x128xf32>
      %17 = arith.maximumf %15, %16 : vector<200x128xf32>
      %18 = arith.truncf %17 : vector<200x128xf32> to vector<200x128xbf16>
      %c0_15 = arith.constant 0 : index
      %c0_16 = arith.constant 0 : index
      %19 = vector.load %arg5[%c0_15, %c0_16] : memref<128x128xbf16, #tpu.memory_space<vmem>>, vector<128x128xbf16>
      %cst_17 = arith.constant dense<0.000000e+00> : vector<200x128xf32>
      %20 = tpu.matmul %18, %19, %cst_17 {dimension_numbers = #tpu.dot_dimension_numbers<[1], [0], [0], [1], [0, 0, 1, 1], [], []>} : vector<200x128xbf16>, vector<128x128xbf16>, vector<200x128xf32> -> vector<200x128xf32>
      %21 = arith.truncf %20 : vector<200x128xf32> to vector<200x128xbf16>
      %c0_18 = arith.constant 0 : index
      %c0_19 = arith.constant 0 : index
      %22 = vector.load %arg6[%c0_18, %c0_19] : memref<200x128xbf16, #tpu.memory_space<vmem>>, vector<200x128xbf16>
      tpu.vector_store %arg6[%c0_18, %c0_19], %21 {strides = array<i32>} : memref<200x128xbf16, #tpu.memory_space<vmem>>, vector<200x128xbf16>,
    } else {
    }
    return
  }
  func.func @transform_0(%arg0: i32, %arg1: i32) -> (i32, i32) {
    %c0_i32 = arith.constant 0 : i32
    return %arg0, %arg1 : i32, i32
  }
  func.func @transform_1(%arg0: i32, %arg1: i32) -> (i32, i32) {
    %c0_i32 = arith.constant 0 : i32
    %c0_i32_0 = arith.constant 0 : i32
    return %arg1, %c0_i32 : i32, i32
  }
  func.func @transform_2(%arg0: i32, %arg1: i32) -> (i32, i32) {
    %c0_i32 = arith.constant 0 : i32
    %c0_i32_0 = arith.constant 0 : i32
    %c0_i32_1 = arith.constant 0 : i32
    return %c0_i32, %c0_i32_0 : i32, i32
  }
  func.func @transform_3(%arg0: i32, %arg1: i32) -> (i32, i32) {
    %c0_i32 = arith.constant 0 : i32
    %c0_i32_0 = arith.constant 0 : i32
    %c0_i32_1 = arith.constant 0 : i32
    return %c0_i32, %c0_i32_0 : i32, i32
  }
  func.func @transform_4(%arg0: i32, %arg1: i32) -> (i32, i32) {
    %c0_i32 = arith.constant 0 : i32
    %c0_i32_0 = arith.constant 0 : i32
    return %arg0, %c0_i32 : i32, i32
  }
}

module attributes {stable_mosaic.version = 11 : i64} {
  func.func @kernel(%arg0: i32, %arg1: i32, %arg2: memref<200x200xbf16, #tpu.memory_space<vmem>>, %arg3: memref<200x128xbf16, #tpu.memory_space<vmem>>, %arg4: memref<1x128xf32, #tpu.memory_space<vmem>>, %arg5: memref<200x128xf32, #tpu.memory_space<vmem>>) attributes {dimension_semantics = [#tpu.dimension_semantics<parallel>, #tpu.dimension_semantics<arbitrary>], iteration_bounds = array<i64: 1, 1>, scalar_prefetch = 0 : i64, scratch_operands = 0 : i64, tpu.core_type = #tpu.core_type<tc>, window_params = [{transform_indices = @transform_0, window_bounds = array<i64: 200, 200>}, {transform_indices = @transform_1, window_bounds = array<i64: 200, 128>}, {pipeline_mode = #tpu.pipeline_mode<synchronous>, transform_indices = @transform_2, window_bounds = array<i64: 1, 128>}, {transform_indices = @transform_3, window_bounds = array<i64: 200, 128>}]} {
    %c0_i32 = arith.constant 0 : i32
    %0 = arith.cmpi eq, %arg1, %c0_i32 : i32
    %1 = arith.extui %0 : i1 to i32
    %c0_i32_0 = arith.constant 0 : i32
    %2 = arith.cmpi ne, %1, %c0_i32_0 : i32
    scf.if %2 {
      %cst_10 = arith.constant 0.000000e+00 : f32
      %12 = vector.broadcast %cst_10 : f32 to vector<200x128xf32>
      %c0_11 = arith.constant 0 : index
      %c0_12 = arith.constant 0 : index
      %13 = vector.load %arg5[%c0_11, %c0_12] : memref<200x128xf32, #tpu.memory_space<vmem>>, vector<200x128xf32>
      tpu.vector_store %arg5[%c0_11, %c0_12], %12 {strides = array<i32>} : memref<200x128xf32, #tpu.memory_space<vmem>>, vector<200x128xf32>,
    } else {
    }
    %c0 = arith.constant 0 : index
    %c0_1 = arith.constant 0 : index
    %3 = vector.load %arg5[%c0, %c0_1] : memref<200x128xf32, #tpu.memory_space<vmem>>, vector<200x128xf32>
    %c0_2 = arith.constant 0 : index
    %c0_3 = arith.constant 0 : index
    %4 = vector.load %arg2[%c0_2, %c0_3] : memref<200x200xbf16, #tpu.memory_space<vmem>>, vector<200x200xbf16>
    %c0_4 = arith.constant 0 : index
    %c0_5 = arith.constant 0 : index
    %5 = vector.load %arg3[%c0_4, %c0_5] : memref<200x128xbf16, #tpu.memory_space<vmem>>, vector<200x128xbf16>
    %cst = arith.constant dense<0.000000e+00> : vector<200x128xf32>
    %6 = tpu.matmul %4, %5, %cst {dimension_numbers = #tpu.dot_dimension_numbers<[1], [0], [0], [1], [0, 0, 1, 1], [], []>} : vector<200x200xbf16>, vector<200x128xbf16>, vector<200x128xf32> -> vector<200x128xf32>
    %7 = arith.addf %3, %6 : vector<200x128xf32>
    %c0_6 = arith.constant 0 : index
    %c0_7 = arith.constant 0 : index
    %8 = vector.load %arg5[%c0_6, %c0_7] : memref<200x128xf32, #tpu.memory_space<vmem>>, vector<200x128xf32>
    tpu.vector_store %arg5[%c0_6, %c0_7], %7 {strides = array<i32>} : memref<200x128xf32, #tpu.memory_space<vmem>>, vector<200x128xf32>,
    %c0_i32_8 = arith.constant 0 : i32
    %9 = arith.cmpi eq, %arg1, %c0_i32_8 : i32
    %10 = arith.extui %9 : i1 to i32
    %c0_i32_9 = arith.constant 0 : i32
    %11 = arith.cmpi ne, %10, %c0_i32_9 : i32
    scf.if %11 {
      %c0_10 = arith.constant 0 : index
      %c0_11 = arith.constant 0 : index
      %12 = vector.load %arg5[%c0_10, %c0_11] : memref<200x128xf32, #tpu.memory_space<vmem>>, vector<200x128xf32>
      %c0_12 = arith.constant 0 : index
      %c0_13 = arith.constant 0 : index
      %13 = vector.load %arg4[%c0_12, %c0_13] : memref<1x128xf32, #tpu.memory_space<vmem>>, vector<1x128xf32>
      %14 = vector.broadcast %13 : vector<1x128xf32> to vector<200x128xf32>
      %15 = arith.addf %12, %14 : vector<200x128xf32>
      %c0_14 = arith.constant 0 : index
      %c0_15 = arith.constant 0 : index
      %16 = vector.load %arg5[%c0_14, %c0_15] : memref<200x128xf32, #tpu.memory_space<vmem>>, vector<200x128xf32>
      tpu.vector_store %arg5[%c0_14, %c0_15], %15 {strides = array<i32>} : memref<200x128xf32, #tpu.memory_space<vmem>>, vector<200x128xf32>,
    } else {
    }
    return
  }
  func.func @transform_0(%arg0: i32, %arg1: i32) -> (i32, i32) {
    %c0_i32 = arith.constant 0 : i32
    return %arg0, %arg1 : i32, i32
  }
  func.func @transform_1(%arg0: i32, %arg1: i32) -> (i32, i32) {
    %c0_i32 = arith.constant 0 : i32
    %c0_i32_0 = arith.constant 0 : i32
    return %arg1, %c0_i32 : i32, i32
  }
  func.func @transform_2(%arg0: i32, %arg1: i32) -> (i32, i32) {
    %c0_i32 = arith.constant 0 : i32
    %c0_i32_0 = arith.constant 0 : i32
    %c0_i32_1 = arith.constant 0 : i32
    return %c0_i32, %c0_i32_0 : i32, i32
  }
  func.func @transform_3(%arg0: i32, %arg1: i32) -> (i32, i32) {
    %c0_i32 = arith.constant 0 : i32
    %c0_i32_0 = arith.constant 0 : i32
    return %arg0, %c0_i32 : i32, i32
  }
}

</mosaic_0001>

<bundles_post_ra>
// kernel: gcn_forward.7
= control target key start
LH: loop header
LB: loop body
LE: loop exit
PB: predicated region body
PF: predicated region fallthrough
CT: control target
= control target key end

     0   :  { %v759_v0 = vmov 0   ;;  %vm308_vm0 = vcmask 588800   ;;  %vm348_vm1 = vcmask 1043456   ;;  %s1038_s1 = inlined_call_operand.vmem [shape: bf16[200,128], index: 1, kind: input, shape index: {}]   ;;  %s1039_s0 = inlined_call_operand.vmem [shape: bf16[200,200], index: 0, kind: input, shape index: {}]   ;;  %s1040_s2 = inlined_call_operand.vmem [shape: f32[1,128], index: 2, kind: input, shape index: {}]   ;;  %s1041_s3 = inlined_call_operand.vmem [shape: f32[200,128], index: 3, kind: output, shape index: {}]  }
   0x1   :  { %352 = vmatprep.subr.bf16.mxu0 %v759_v0  ;;  %v708_v1 = vld [vmem:[%s1038_s1] sm:$0xff]   ;;  %680 = vmatprep.subr.bf16.mxu1 %v759_v0  ;;  %v709_v2 = vld [vmem:[%s1038_s1 + $0x8] sm:$0xff]   ;;  %v710_v3 = vld [vmem:[%s1038_s1 + $0x10] sm:$0xff]  }
   0x2   :  { %353 = vmatpush1.bf16.msra.mxu0 %v708_v1  ;;  %693 = vmatpush1.bf16.msra.mxu1 %v708_v1  ;;  %v711_v4 = vld [vmem:[%s1038_s1 + $0x18] sm:$0xff]   ;;  %v723_v5 = vld [vmem:[%s1039_s0 + $0x4] ss:$8 sps:$4 sm:$0xff]   ;;  %v714_v9 = vld [vmem:[%s1038_s1 + $0x30] sm:$0xff]  }
   0x3   :  { %354 = vmatprep.subr.bf16.mxu0 %v759_v0  ;;  %681 = vmatprep.subr.bf16.mxu1 %v759_v0  ;;  %v712_v6 = vld [vmem:[%s1038_s1 + $0x20] sm:$0xff]   ;;  %v726_v7 = vld [vmem:[%s1039_s0 + $0x74] ss:$8 sps:$4 sm:$0xff]   ;;  %v713_v8 = vld [vmem:[%s1038_s1 + $0x28] sm:$0xff]  }
   0x4   :  { %666 = vmatprep.mubr.msk.bf16.mxu0 %vm308_vm0, %v723_v5  ;;  %673 = vmatprep.mubr.msk.bf16.mxu1 %vm308_vm0, %v726_v7  ;;  %v715_v10 = vld [vmem:[%s1038_s1 + $0x38] sm:$0xff]   ;;  %v716_v11 = vld [vmem:[%s1038_s1 + $0x40] sm:$0xff]   ;;  %v717_v12 = vld [vmem:[%s1038_s1 + $0x48] sm:$0xff]  }
   0x5   :  { %v718_v13 = vld [vmem:[%s1038_s1 + $0x50] sm:$0xff]   ;;  %v719_v14 = vld [vmem:[%s1038_s1 + $0x58] sm:$0xff]   ;;  %v720_v15 = vld [vmem:[%s1038_s1 + $0x60] ss:$0 sps:$4 sm:$0xff]  }
   0x6   :  { %355 = vmatpush1.bf16.msra.mxu0 %v709_v2  ;;  %694 = vmatpush1.bf16.msra.mxu1 %v709_v2  ;;  %v350_v16 = vsel %vm348_vm1, %v720_v15, 0  ;;  %v721_v17 = vld [vmem:[%s1039_s0] ss:$8 sps:$4 sm:$0xff]   ;;  %v724_v18 = vld [vmem:[%s1039_s0 + $0x70] ss:$8 sps:$4 sm:$0xff]  }
   0x7   :  { %356 = vmatprep.subr.bf16.mxu0 %v759_v0  ;;  %682 = vmatprep.subr.bf16.mxu1 %v759_v0  ;;  %v727_v19 = vld [vmem:[%s1039_s0 + $0x14] ss:$8 sps:$4 sm:$0xff]   ;;  %v730_v20 = vld [vmem:[%s1039_s0 + $0x84] ss:$8 sps:$4 sm:$0xff]   ;;  %v729_v21 = vld [vmem:[%s1039_s0 + $0x10] ss:$8 sps:$4 sm:$0xff]  }
   0x8   :  { %v734_v22 = vld [vmem:[%s1039_s0 + $0x80] ss:$8 sps:$4 sm:$0xff]   ;;  %v732_v23 = vld [vmem:[%s1039_s0 + $0x24] ss:$8 sps:$4 sm:$0xff]   ;;  %v736_v24 = vld [vmem:[%s1039_s0 + $0x94] ss:$8 sps:$4 sm:$0xff]  }
   0x9   :  { %v735_v25 = vld [vmem:[%s1039_s0 + $0x20] ss:$8 sps:$4 sm:$0xff]   ;;  %v740_v26 = vld [vmem:[%s1039_s0 + $0x90] ss:$8 sps:$4 sm:$0xff]   ;;  %v738_v27 = vld [vmem:[%s1039_s0 + $0x34] ss:$8 sps:$4 sm:$0xff]  }
   0xa   :  { %357 = vmatpush1.bf16.msra.mxu0 %v710_v3  ;;  %695 = vmatpush1.bf16.msra.mxu1 %v710_v3  ;;  %v742_v28 = vld [vmem:[%s1039_s0 + $0xa4] ss:$8 sps:$4 sm:$0xff]   ;;  %v741_v29 = vld [vmem:[%s1039_s0 + $0x30] ss:$8 sps:$4 sm:$0xff]   ;;  %v746_v30 = vld [vmem:[%s1039_s0 + $0xa0] ss:$8 sps:$4 sm:$0xff]  }
   0xb   :  { %358 = vmatprep.subr.bf16.mxu0 %v759_v0  ;;  %683 = vmatprep.subr.bf16.mxu1 %v759_v0  ;;  %v744_v31 = vld [vmem:[%s1039_s0 + $0x44] ss:$8 sps:$4 sm:$0xff]   ;;  %v748_v32 = vld [vmem:[%s1039_s0 + $0xb4] ss:$8 sps:$4 sm:$0xff]   ;;  %v747_v34 = vld [vmem:[%s1039_s0 + $0x40] ss:$8 sps:$4 sm:$0xff]  }
   0xc   :  { %v93_v33 = vld [vmem:[%s1039_s0 + $0xc0] sm:$0xff]  ;;  %v752_v35 = vld [vmem:[%s1039_s0 + $0xb0] ss:$8 sps:$4 sm:$0xff]   ;;  %v750_v36 = vld [vmem:[%s1039_s0 + $0x54] ss:$8 sps:$4 sm:$0xff]  }
   0xd   :  { %v652_v37 = vcombine.high %v93_v33, %v93_v33  ;;  %v753_v38 = vld [vmem:[%s1039_s0 + $0x50] ss:$8 sps:$4 sm:$0xff]   ;;  %v651_v39 = vcombine.low %v93_v33, %v93_v33  ;;  %v755_v40 = vld [vmem:[%s1039_s0 + $0x64] ss:$8 sps:$4 sm:$0xff]   ;;  %v758_v41 = vld [vmem:[%s1039_s0 + $0x60] ss:$8 sps:$4 sm:$0xff]  }
   0xe   :  { %359 = vmatpush1.bf16.msra.mxu0 %v711_v4  ;;  %696 = vmatpush1.bf16.msra.mxu1 %v711_v4  ;;  %v936_v43 = vld [vmem:[%s1040_s2] ss:$0 sm:$0xff] }
   0xf   :  { %360 = vmatprep.subr.bf16.mxu0 %v759_v0  ;;  %684 = vmatprep.subr.bf16.mxu1 %v759_v0 }
  0x12   :  { %361 = vmatpush1.bf16.msra.mxu0 %v712_v6  ;;  %697 = vmatpush1.bf16.msra.mxu1 %v712_v6 }
  0x13   :  { %362 = vmatprep.subr.bf16.mxu0 %v759_v0  ;;  %685 = vmatprep.subr.bf16.mxu1 %v759_v0 }
  0x16   :  { %363 = vmatpush1.bf16.msra.mxu0 %v713_v8  ;;  %698 = vmatpush1.bf16.msra.mxu1 %v713_v8 }
  0x17   :  { %364 = vmatprep.subr.bf16.mxu0 %v759_v0  ;;  %686 = vmatprep.subr.bf16.mxu1 %v759_v0 }
  0x1a   :  { %365 = vmatpush1.bf16.msra.mxu0 %v714_v9  ;;  %699 = vmatpush1.bf16.msra.mxu1 %v714_v9 }
  0x1b   :  { %366 = vmatprep.subr.bf16.mxu0 %v759_v0  ;;  %687 = vmatprep.subr.bf16.mxu1 %v759_v0 }
  0x1e   :  { %367 = vmatpush1.bf16.msra.mxu0 %v715_v10  ;;  %700 = vmatpush1.bf16.msra.mxu1 %v715_v10 }
  0x1f   :  { %368 = vmatprep.subr.bf16.mxu0 %v759_v0  ;;  %688 = vmatprep.subr.bf16.mxu1 %v759_v0 }
  0x22   :  { %369 = vmatpush1.bf16.msra.mxu0 %v716_v11  ;;  %701 = vmatpush1.bf16.msra.mxu1 %v716_v11 }
  0x23   :  { %370 = vmatprep.subr.bf16.mxu0 %v759_v0  ;;  %689 = vmatprep.subr.bf16.mxu1 %v759_v0 }
  0x26   :  { %371 = vmatpush1.bf16.msra.mxu0 %v717_v12  ;;  %702 = vmatpush1.bf16.msra.mxu1 %v717_v12 }
  0x27   :  { %372 = vmatprep.subr.bf16.mxu0 %v759_v0  ;;  %690 = vmatprep.subr.bf16.mxu1 %v759_v0 }
  0x2a   :  { %373 = vmatpush1.bf16.msra.mxu0 %v718_v13  ;;  %703 = vmatpush1.bf16.msra.mxu1 %v718_v13 }
  0x2b   :  { %374 = vmatprep.subr.bf16.mxu0 %v759_v0  ;;  %691 = vmatprep.subr.bf16.mxu1 %v759_v0 }
  0x2e   :  { %375 = vmatpush1.bf16.msra.mxu0 %v719_v14  ;;  %704 = vmatpush1.bf16.msra.mxu1 %v719_v14 }
  0x2f   :  { %376 = vmatprep.subr.bf16.mxu0 %v759_v0  ;;  %692 = vmatprep.subr.bf16.mxu1 %v759_v0 }
  0x32   :  { %377 = vmatpush1.bf16.msra.mxu0 %v350_v16  ;;  %705 = vmatpush1.bf16.msra.mxu1 %v350_v16 }
  0x35   :  { %385 = vmatmul.mubr.bf16.vlgmr.msra.gmra.mrb[0].mxu0 %v721_v17  ;;  %441 = vmatmul.mubr.bf16.vlgmr.msra.gmra.mrb[0].mxu1 %v724_v18 }
  0x36   :  { %667 = vmatprep.mubr.msk.bf16.mxu0 %vm308_vm0, %v727_v19  ;;  %674 = vmatprep.mubr.msk.bf16.mxu1 %vm308_vm0, %v730_v20 }
  0x3d   :  { %393 = vmatmul.mubr.bf16.gmra.mrb[4].mxu0 %v729_v21  ;;  %449 = vmatmul.mubr.bf16.gmra.mrb[4].mxu1 %v734_v22 }
  0x3e   :  { %668 = vmatprep.mubr.msk.bf16.mxu0 %vm308_vm0, %v732_v23  ;;  %675 = vmatprep.mubr.msk.bf16.mxu1 %vm308_vm0, %v736_v24 }
  0x45   :  { %401 = vmatmul.mubr.bf16.gmra.mrb[8].mxu0 %v735_v25  ;;  %457 = vmatmul.mubr.bf16.gmra.mrb[8].mxu1 %v740_v26 }
  0x46   :  { %669 = vmatprep.mubr.msk.bf16.mxu0 %vm308_vm0, %v738_v27  ;;  %676 = vmatprep.mubr.msk.bf16.mxu1 %vm308_vm0, %v742_v28 }
  0x4d   :  { %409 = vmatmul.mubr.bf16.gmra.mrb[12].mxu0 %v741_v29  ;;  %465 = vmatmul.mubr.bf16.gmra.mrb[12].mxu1 %v746_v30 }
  0x4e   :  { %670 = vmatprep.mubr.msk.bf16.mxu0 %vm308_vm0, %v744_v31  ;;  %677 = vmatprep.mubr.msk.bf16.mxu1 %vm308_vm0, %v748_v32 }
  0x55   :  { %417 = vmatmul.mubr.bf16.gmra.mrb[16].mxu0 %v747_v34  ;;  %473 = vmatmul.mubr.bf16.gmra.mrb[16].mxu1 %v752_v35 }
  0x56   :  { %671 = vmatprep.mubr.msk.bf16.mxu0 %vm308_vm0, %v750_v36  ;;  %678 = vmatprep.mubr.msk.bf16.mxu1 %vm308_vm0, %v652_v37 }
  0x5d   :  { %425 = vmatmul.mubr.bf16.gmra.mrb[20].mxu0 %v753_v38  ;;  %481 = vmatmul.mubr.bf16.gmra.mrb[20].mxu1 %v651_v39 }
  0x5e   :  { %672 = vmatprep.mubr.msk.bf16.mxu0 %vm308_vm0, %v755_v40 }
  0x65   :  { %433 = vmatmul.mubr.bf16.gmra.mrb[24].mxu0 %v758_v41 }
 0x108   :  { %v386_v42 = vpop.f32.mrb[0].mxu0  ;;  %v442_v44 = vpop.f32.mrb[0].mxu1 }
 0x109   :  { %v388_v45 = vpop.f32.mrb[1].mxu0  ;;  %v444_v46 = vpop.f32.mrb[1].mxu1  ;;  %v573_v49 = vadd.f32 %v936_v43, %v386_v42  ;;  %v587_v51 = vadd.f32 %v936_v43, %v442_v44 }
 0x10a   :  { %v389_v47 = vpop.f32.mrb[2].mxu0  ;;  %v445_v48 = vpop.f32.mrb[2].mxu1 }
 0x10b   :  { %v391_v50 = vpop.f32.mrb[3].mxu0  ;;  %v447_v52 = vpop.f32.mrb[3].mxu1  ;;  %598 = vst [vmem:[%s1041_s3] sm:$0xff] %v573_v49  ;;  %v574_v53 = vadd.f32 %v936_v43, %v389_v47  ;;  %612 = vst [vmem:[%s1041_s3 + $0x70] sm:$0xff] %v587_v51  ;;  %v588_v54 = vadd.f32 %v936_v43, %v445_v48 }
 0x10d   :  { %599 = vst [vmem:[%s1041_s3 + $0x8] sm:$0xff] %v574_v53  ;;  %613 = vst [vmem:[%s1041_s3 + $0x78] sm:$0xff] %v588_v54 }
 0x110   :  { %v394_v55 = vpop.f32.mrb[4].mxu0  ;;  %v450_v56 = vpop.f32.mrb[4].mxu1 }
 0x111   :  { %v396_v57 = vpop.f32.mrb[5].mxu0  ;;  %v452_v58 = vpop.f32.mrb[5].mxu1  ;;  %v575_v61 = vadd.f32 %v936_v43, %v394_v55  ;;  %v589_v63 = vadd.f32 %v936_v43, %v450_v56 }
 0x112   :  { %v397_v59 = vpop.f32.mrb[6].mxu0  ;;  %v453_v60 = vpop.f32.mrb[6].mxu1 }
 0x113   :  { %v399_v62 = vpop.f32.mrb[7].mxu0  ;;  %v455_v0 = vpop.f32.mrb[7].mxu1  ;;  %600 = vst [vmem:[%s1041_s3 + $0x10] sm:$0xff] %v575_v61  ;;  %v576_v1 = vadd.f32 %v936_v43, %v397_v59  ;;  %614 = vst [vmem:[%s1041_s3 + $0x80] sm:$0xff] %v589_v63  ;;  %v590_v2 = vadd.f32 %v936_v43, %v453_v60 }
 0x115   :  { %601 = vst [vmem:[%s1041_s3 + $0x18] sm:$0xff] %v576_v1  ;;  %615 = vst [vmem:[%s1041_s3 + $0x88] sm:$0xff] %v590_v2 }
 0x118   :  { %v402_v3 = vpop.f32.mrb[8].mxu0  ;;  %v458_v4 = vpop.f32.mrb[8].mxu1 }
 0x119   :  { %v404_v5 = vpop.f32.mrb[9].mxu0  ;;  %v460_v6 = vpop.f32.mrb[9].mxu1  ;;  %v577_v9 = vadd.f32 %v936_v43, %v402_v3  ;;  %v591_v11 = vadd.f32 %v936_v43, %v458_v4 }
 0x11a   :  { %v405_v7 = vpop.f32.mrb[10].mxu0  ;;  %v461_v8 = vpop.f32.mrb[10].mxu1 }
 0x11b   :  { %v407_v10 = vpop.f32.mrb[11].mxu0  ;;  %v463_v12 = vpop.f32.mrb[11].mxu1  ;;  %602 = vst [vmem:[%s1041_s3 + $0x20] sm:$0xff] %v577_v9  ;;  %v578_v13 = vadd.f32 %v936_v43, %v405_v7  ;;  %616 = vst [vmem:[%s1041_s3 + $0x90] sm:$0xff] %v591_v11  ;;  %v592_v14 = vadd.f32 %v936_v43, %v461_v8 }
 0x11d   :  { %603 = vst [vmem:[%s1041_s3 + $0x28] sm:$0xff] %v578_v13  ;;  %617 = vst [vmem:[%s1041_s3 + $0x98] sm:$0xff] %v592_v14 }
 0x120   :  { %v410_v15 = vpop.f32.mrb[12].mxu0  ;;  %v466_v16 = vpop.f32.mrb[12].mxu1 }
 0x121   :  { %v412_v17 = vpop.f32.mrb[13].mxu0  ;;  %v468_v18 = vpop.f32.mrb[13].mxu1  ;;  %v579_v21 = vadd.f32 %v936_v43, %v410_v15  ;;  %v593_v23 = vadd.f32 %v936_v43, %v466_v16 }
 0x122   :  { %v413_v19 = vpop.f32.mrb[14].mxu0  ;;  %v469_v20 = vpop.f32.mrb[14].mxu1 }
 0x123   :  { %v415_v22 = vpop.f32.mrb[15].mxu0  ;;  %v471_v24 = vpop.f32.mrb[15].mxu1  ;;  %604 = vst [vmem:[%s1041_s3 + $0x30] sm:$0xff] %v579_v21  ;;  %v580_v25 = vadd.f32 %v936_v43, %v413_v19  ;;  %618 = vst [vmem:[%s1041_s3 + $0xa0] sm:$0xff] %v593_v23  ;;  %v594_v26 = vadd.f32 %v936_v43, %v469_v20 }
 0x125   :  { %605 = vst [vmem:[%s1041_s3 + $0x38] sm:$0xff] %v580_v25  ;;  %619 = vst [vmem:[%s1041_s3 + $0xa8] sm:$0xff] %v594_v26 }
 0x128   :  { %v418_v27 = vpop.f32.mrb[16].mxu0  ;;  %v474_v28 = vpop.f32.mrb[16].mxu1 }
 0x129   :  { %v420_v29 = vpop.f32.mrb[17].mxu0  ;;  %v476_v30 = vpop.f32.mrb[17].mxu1  ;;  %v581_v33 = vadd.f32 %v936_v43, %v418_v27  ;;  %v595_v35 = vadd.f32 %v936_v43, %v474_v28 }
 0x12a   :  { %v421_v31 = vpop.f32.mrb[18].mxu0  ;;  %v477_v32 = vpop.f32.mrb[18].mxu1 }
 0x12b   :  { %v423_v34 = vpop.f32.mrb[19].mxu0  ;;  %v479_v36 = vpop.f32.mrb[19].mxu1  ;;  %606 = vst [vmem:[%s1041_s3 + $0x40] sm:$0xff] %v581_v33  ;;  %v582_v37 = vadd.f32 %v936_v43, %v421_v31  ;;  %620 = vst [vmem:[%s1041_s3 + $0xb0] sm:$0xff] %v595_v35  ;;  %v596_v38 = vadd.f32 %v936_v43, %v477_v32 }
 0x12d   :  { %607 = vst [vmem:[%s1041_s3 + $0x48] sm:$0xff] %v582_v37  ;;  %621 = vst [vmem:[%s1041_s3 + $0xb8] sm:$0xff] %v596_v38 }
 0x130   :  { %v426_v39 = vpop.f32.mrb[20].mxu0  ;;  %v482_v40 = vpop.f32.mrb[20].mxu1 }
 0x131   :  { %v428_v41 = vpop.f32.mrb[21].mxu0  ;;  %v484_v42 = vpop.f32.mrb[21].mxu1  ;;  %v583_v46 = vadd.f32 %v936_v43, %v426_v39  ;;  %v597_v48 = vadd.f32 %v936_v43, %v482_v40 }
 0x132   :  { %v429_v44 = vpop.f32.mrb[22].mxu0  ;;  %v485_v45 = vpop.f32.mrb[22].mxu1 }
 0x133   :  { %v431_v47 = vpop.f32.mrb[23].mxu0  ;;  %v486_v49 = vpop.f32.mrb[23].mxu1  ;;  %608 = vst [vmem:[%s1041_s3 + $0x50] sm:$0xff] %v583_v46  ;;  %v584_v50 = vadd.f32 %v936_v43, %v429_v44  ;;  %622 = vst [vmem:[%s1041_s3 + $0xc0] sm:$0xff] %v597_v48 }
 0x135   :  { %609 = vst [vmem:[%s1041_s3 + $0x58] sm:$0xff] %v584_v50 }
 0x138   :  { %v434_v51 = vpop.f32.mrb[24].mxu0 }
 0x139   :  { %v436_v52 = vpop.f32.mrb[25].mxu0  ;;  %v585_v54 = vadd.f32 %v936_v43, %v434_v51 }
 0x13a   :  { %v437_v53 = vpop.f32.mrb[26].mxu0 }
 0x13b   :  { %v439_v55 = vpop.f32.mrb[27].mxu0  ;;  %610 = vst [vmem:[%s1041_s3 + $0x60] sm:$0xff] %v585_v54  ;;  %v586_v56 = vadd.f32 %v936_v43, %v437_v53 }
 0x13d   :  { %611 = vst [vmem:[%s1041_s3 + $0x68] sm:$0xff] %v586_v56 }

// kernel: gcn_forward.4
= control target key start
LH: loop header
LB: loop body
LE: loop exit
PB: predicated region body
PF: predicated region fallthrough
CT: control target
= control target key end

     0   :  { %v795_v0 = vmov 0.0   ;;  %vm796_vm0 = vmmov 0   ;;  %vm170_vm1 = vcmask 261120   ;;  %s922_s1 = inlined_call_operand.vmem [shape: bf16[32,128], index: 1, kind: input, shape index: {}]   ;;  %s923_s0 = inlined_call_operand.vmem [shape: bf16[200,32], index: 0, kind: input, shape index: {}]   ;;  %s924_s2 = inlined_call_operand.vmem [shape: bf16[200,128], index: 2, kind: output, shape index: {}]  }
   0x1   :  { %718 = vmatprep.subr.bf16.mxu0 %v795_v0  ;;  %v780_v1 = vld [vmem:[%s922_s1] sm:$0xff]   ;;  %774 = vmatprep.subr.bf16.mxu1 %v795_v0  ;;  %v781_v2 = vld [vmem:[%s922_s1 + $0x8] sm:$0xff]   ;;  %v783_v4 = vld [vmem:[%s923_s0 + $0x38] sm:$0xff]  }
   0x2   :  { %722 = vmatprep.mubr.msk.bf16.mxu0 %vm796_vm0, %v795_v0  ;;  %750 = vmatprep.mubr.msk.bf16.mxu1 %vm796_vm0, %v795_v0  ;;  %v782_v3 = vld [vmem:[%s923_s0] sm:$0xff]   ;;  %v784_v5 = vld [vmem:[%s923_s0 + $0x8] sm:$0xff]   ;;  %v786_v7 = vld [vmem:[%s923_s0 + $0x10] sm:$0xff]  }
   0x3   :  { %719 = vmatpush3.bf16.msra.mxu0 %v780_v1  ;;  %776 = vmatpush3.bf16.msra.mxu1 %v780_v1  ;;  %v785_v6 = vld [vmem:[%s923_s0 + $0x40] sm:$0xff]   ;;  %v787_v8 = vld [vmem:[%s923_s0 + $0x48] sm:$0xff]   ;;  %v788_v9 = vld [vmem:[%s923_s0 + $0x18] sm:$0xff]  }
   0x4   :  { %720 = vmatprep.subr.bf16.mxu0 %v795_v0  ;;  %775 = vmatprep.subr.bf16.mxu1 %v795_v0  ;;  %v789_v10 = vld [vmem:[%s923_s0 + $0x50] sm:$0xff]   ;;  %v790_v11 = vld [vmem:[%s923_s0 + $0x20] sm:$0xff]   ;;  %v791_v12 = vld [vmem:[%s923_s0 + $0x58] sm:$0xff]  }
   0x5   :  { %v792_v13 = vld [vmem:[%s923_s0 + $0x28] sm:$0xff]   ;;  %v793_v14 = vld [vmem:[%s923_s0 + $0x60] ss:$0 sps:$4 sm:$0xff]   ;;  %v794_v15 = vld [vmem:[%s923_s0 + $0x30] sm:$0xff]  }
   0x7   :  { %721 = vmatpush3.bf16.msra.mxu0 %v781_v2  ;;  %777 = vmatpush3.bf16.msra.mxu1 %v781_v2 }
   0xa   :  { %723 = vmatmul.mubr.msk.bf16.vlgmr.msra.gmra.mrb[0].mxu0 %vm170_vm1, %v782_v3  ;;  %751 = vmatmul.mubr.msk.bf16.vlgmr.msra.gmra.mrb[0].mxu1 %vm170_vm1, %v783_v4 }
   0xb   :  { %726 = vmatprep.mubr.msk.bf16.mxu0 %vm796_vm0, %v795_v0  ;;  %754 = vmatprep.mubr.msk.bf16.mxu1 %vm796_vm0, %v795_v0 }
  0x12   :  { %727 = vmatmul.mubr.msk.bf16.gmra.mrb[4].mxu0 %vm170_vm1, %v784_v5  ;;  %755 = vmatmul.mubr.msk.bf16.gmra.mrb[4].mxu1 %vm170_vm1, %v785_v6 }
  0x13   :  { %730 = vmatprep.mubr.msk.bf16.mxu0 %vm796_vm0, %v795_v0  ;;  %758 = vmatprep.mubr.msk.bf16.mxu1 %vm796_vm0, %v795_v0 }
  0x1a   :  { %731 = vmatmul.mubr.msk.bf16.gmra.mrb[8].mxu0 %vm170_vm1, %v786_v7  ;;  %759 = vmatmul.mubr.msk.bf16.gmra.mrb[8].mxu1 %vm170_vm1, %v787_v8 }
  0x1b   :  { %734 = vmatprep.mubr.msk.bf16.mxu0 %vm796_vm0, %v795_v0  ;;  %762 = vmatprep.mubr.msk.bf16.mxu1 %vm796_vm0, %v795_v0 }
  0x22   :  { %735 = vmatmul.mubr.msk.bf16.gmra.mrb[12].mxu0 %vm170_vm1, %v788_v9  ;;  %763 = vmatmul.mubr.msk.bf16.gmra.mrb[12].mxu1 %vm170_vm1, %v789_v10 }
  0x23   :  { %738 = vmatprep.mubr.msk.bf16.mxu0 %vm796_vm0, %v795_v0  ;;  %766 = vmatprep.mubr.msk.bf16.mxu1 %vm796_vm0, %v795_v0 }
  0x2a   :  { %739 = vmatmul.mubr.msk.bf16.gmra.mrb[16].mxu0 %vm170_vm1, %v790_v11  ;;  %767 = vmatmul.mubr.msk.bf16.gmra.mrb[16].mxu1 %vm170_vm1, %v791_v12 }
  0x2b   :  { %742 = vmatprep.mubr.msk.bf16.mxu0 %vm796_vm0, %v795_v0  ;;  %770 = vmatprep.mubr.msk.bf16.mxu1 %vm796_vm0, %v795_v0 }
  0x32   :  { %743 = vmatmul.mubr.msk.bf16.gmra.mrb[20].mxu0 %vm170_vm1, %v792_v13  ;;  %771 = vmatmul.mubr.msk.bf16.gmra.mrb[20].mxu1 %vm170_vm1, %v793_v14 }
  0x33   :  { %746 = vmatprep.mubr.msk.bf16.mxu0 %vm796_vm0, %v795_v0 }
  0x3a   :  { %747 = vmatmul.mubr.msk.bf16.gmra.mrb[24].mxu0 %vm170_vm1, %v794_v15 }
  0xdd   :  { %v244_v16 = vpop.f32.mrb[0].mxu0  ;;  %v300_v17 = vpop.f32.mrb[0].mxu1 }
  0xde   :  { %v724_v18 = vpop.f32.mrb[1].mxu0  ;;  %v752_v19 = vpop.f32.mrb[1].mxu1 }
  0xdf   :  { %v247_v20 = vpop.f32.mrb[2].mxu0  ;;  %v303_v21 = vpop.f32.mrb[2].mxu1 }
  0xe0   :  { %v635_v22 = vpack.c.bf16 %v247_v20, %v244_v16  ;;  %v725_v23 = vpop.f32.mrb[3].mxu0  ;;  %v670_v24 = vpack.c.bf16 %v303_v21, %v300_v17  ;;  %v753_v25 = vpop.f32.mrb[3].mxu1 }
  0xe2   :  { %636 = vst [vmem:[%s924_s2] sm:$0xff] %v635_v22   ;;  %698 = vst [vmem:[%s924_s2 + $0x38] sm:$0xff] %v670_v24  }
  0xe5   :  { %v252_v26 = vpop.f32.mrb[4].mxu0  ;;  %v308_v27 = vpop.f32.mrb[4].mxu1 }
  0xe6   :  { %v728_v28 = vpop.f32.mrb[5].mxu0  ;;  %v756_v29 = vpop.f32.mrb[5].mxu1 }
  0xe7   :  { %v255_v30 = vpop.f32.mrb[6].mxu0  ;;  %v311_v31 = vpop.f32.mrb[6].mxu1 }
  0xe8   :  { %v640_v32 = vpack.c.bf16 %v255_v30, %v252_v26  ;;  %v729_v33 = vpop.f32.mrb[7].mxu0  ;;  %v675_v34 = vpack.c.bf16 %v311_v31, %v308_v27  ;;  %v757_v35 = vpop.f32.mrb[7].mxu1 }
  0xea   :  { %692 = vst [vmem:[%s924_s2 + $0x8] sm:$0xff] %v640_v32   ;;  %699 = vst [vmem:[%s924_s2 + $0x40] sm:$0xff] %v675_v34  }
  0xed   :  { %v260_v36 = vpop.f32.mrb[8].mxu0  ;;  %v316_v37 = vpop.f32.mrb[8].mxu1 }
  0xee   :  { %v732_v38 = vpop.f32.mrb[9].mxu0  ;;  %v760_v39 = vpop.f32.mrb[9].mxu1 }
  0xef   :  { %v263_v40 = vpop.f32.mrb[10].mxu0  ;;  %v319_v41 = vpop.f32.mrb[10].mxu1 }
  0xf0   :  { %v645_v42 = vpack.c.bf16 %v263_v40, %v260_v36  ;;  %v733_v43 = vpop.f32.mrb[11].mxu0  ;;  %v680_v44 = vpack.c.bf16 %v319_v41, %v316_v37  ;;  %v761_v45 = vpop.f32.mrb[11].mxu1 }
  0xf2   :  { %693 = vst [vmem:[%s924_s2 + $0x10] sm:$0xff] %v645_v42   ;;  %700 = vst [vmem:[%s924_s2 + $0x48] sm:$0xff] %v680_v44  }
  0xf5   :  { %v268_v46 = vpop.f32.mrb[12].mxu0  ;;  %v324_v47 = vpop.f32.mrb[12].mxu1 }
  0xf6   :  { %v736_v48 = vpop.f32.mrb[13].mxu0  ;;  %v764_v49 = vpop.f32.mrb[13].mxu1 }
  0xf7   :  { %v271_v50 = vpop.f32.mrb[14].mxu0  ;;  %v327_v51 = vpop.f32.mrb[14].mxu1 }
  0xf8   :  { %v650_v52 = vpack.c.bf16 %v271_v50, %v268_v46  ;;  %v737_v53 = vpop.f32.mrb[15].mxu0  ;;  %v685_v54 = vpack.c.bf16 %v327_v51, %v324_v47  ;;  %v765_v55 = vpop.f32.mrb[15].mxu1 }
  0xfa   :  { %694 = vst [vmem:[%s924_s2 + $0x18] sm:$0xff] %v650_v52   ;;  %701 = vst [vmem:[%s924_s2 + $0x50] sm:$0xff] %v685_v54  }
  0xfd   :  { %v276_v56 = vpop.f32.mrb[16].mxu0  ;;  %v332_v57 = vpop.f32.mrb[16].mxu1 }
  0xfe   :  { %v740_v58 = vpop.f32.mrb[17].mxu0  ;;  %v768_v59 = vpop.f32.mrb[17].mxu1 }
  0xff   :  { %v279_v60 = vpop.f32.mrb[18].mxu0  ;;  %v335_v61 = vpop.f32.mrb[18].mxu1 }
 0x100   :  { %v655_v62 = vpack.c.bf16 %v279_v60, %v276_v56  ;;  %v741_v63 = vpop.f32.mrb[19].mxu0  ;;  %v690_v0 = vpack.c.bf16 %v335_v61, %v332_v57  ;;  %v769_v1 = vpop.f32.mrb[19].mxu1 }
 0x102   :  { %695 = vst [vmem:[%s924_s2 + $0x20] sm:$0xff] %v655_v62   ;;  %702 = vst [vmem:[%s924_s2 + $0x58] sm:$0xff] %v690_v0  }
 0x105   :  { %v284_v2 = vpop.f32.mrb[20].mxu0  ;;  %v340_v3 = vpop.f32.mrb[20].mxu1 }
 0x106   :  { %v744_v4 = vpop.f32.mrb[21].mxu0  ;;  %v631_v5 = vpack.c.bf16 %v340_v3, %v340_v3  ;;  %v772_v6 = vpop.f32.mrb[21].mxu1 }
 0x107   :  { %v287_v7 = vpop.f32.mrb[22].mxu0  ;;  %v343_v8 = vpop.f32.mrb[22].mxu1 }
 0x108   :  { %v660_v9 = vpack.c.bf16 %v287_v7, %v284_v2  ;;  %v745_v10 = vpop.f32.mrb[23].mxu0  ;;  %549 = vst [vmem:[%s924_s2 + $0x60] sm:$0xf] %v631_v5  ;;  %v773_v11 = vpop.f32.mrb[23].mxu1 }
 0x10a   :  { %696 = vst [vmem:[%s924_s2 + $0x28] sm:$0xff] %v660_v9  }
 0x10d   :  { %v292_v12 = vpop.f32.mrb[24].mxu0 }
 0x10e   :  { %v748_v13 = vpop.f32.mrb[25].mxu0 }
 0x10f   :  { %v295_v14 = vpop.f32.mrb[26].mxu0 }
 0x110   :  { %v665_v15 = vpack.c.bf16 %v295_v14, %v292_v12  ;;  %v749_v16 = vpop.f32.mrb[27].mxu0 }
 0x112   :  { %697 = vst [vmem:[%s924_s2 + $0x30] sm:$0xff] %v665_v15  }

// kernel: gcn_forward.5
= control target key start
LH: loop header
LB: loop body
LE: loop exit
PB: predicated region body
PF: predicated region fallthrough
CT: control target
= control target key end

     0   :  { %v1302_v0 = vmov 0   ;;  %vm311_vm0 = vcmask 588800   ;;  %v1303_v9 = vmov 0.0   ;;  %vm351_vm1 = vcmask 1043456   ;;  %s1584_s1 = inlined_call_operand.vmem [shape: bf16[200,128], index: 1, kind: input, shape index: {}]   ;;  %s1585_s0 = inlined_call_operand.vmem [shape: bf16[200,200], index: 0, kind: input, shape index: {}]   ;;  %s1586_s3 = inlined_call_operand.vmem [shape: bf16[128,128], index: 3, kind: input, shape index: {}]   ;;  %s1587_s2 = inlined_call_operand.vmem [shape: f32[1,128], index: 2, kind: input, shape index: {}]   ;;  %s1588_s4 = inlined_call_operand.vmem [shape: bf16[200,128], index: 4, kind: output, shape index: {}]  }
   0x1   :  { %355 = vmatprep.subr.bf16.mxu0 %v1302_v0  ;;  %v1243_v1 = vld [vmem:[%s1584_s1] sm:$0xff]   ;;  %v1244_v2 = vld [vmem:[%s1584_s1 + $0x8] sm:$0xff]   ;;  %v1245_v3 = vld [vmem:[%s1584_s1 + $0x10] sm:$0xff]   ;;  %1172 = vmatprep.subr.bf16.mxu1 %v1303_v9  ;;  %vm1304_vm2 = vmmov 0  }
   0x2   :  { %356 = vmatpush1.bf16.msra.mxu0 %v1243_v1  ;;  %v1246_v4 = vld [vmem:[%s1584_s1 + $0x18] sm:$0xff]   ;;  %v1258_v5 = vld [vmem:[%s1585_s0 + $0x4] ss:$8 sps:$4 sm:$0xff]   ;;  %v1249_v8 = vld [vmem:[%s1584_s1 + $0x30] sm:$0xff]   ;;  %1188 = vmatprep.mubr.msk.bf16.mxu1 %vm1304_vm2, %v1303_v9 }
   0x3   :  { %357 = vmatprep.subr.bf16.mxu0 %v1302_v0  ;;  %v1247_v6 = vld [vmem:[%s1584_s1 + $0x20] sm:$0xff]   ;;  %1008 = vmatprep.mubr.msk.bf16.mxu0 %vm311_vm0, %v1258_v5  ;;  %v1248_v7 = vld [vmem:[%s1584_s1 + $0x28] sm:$0xff]   ;;  %v1250_v10 = vld [vmem:[%s1584_s1 + $0x38] sm:$0xff]  }
   0x4   :  { %v1294_v11 = vld [vmem:[%s1586_s3] sm:$0xff]   ;;  %v1295_v13 = vld [vmem:[%s1586_s3 + $0x8] sm:$0xff]   ;;  %v1296_v15 = vld [vmem:[%s1586_s3 + $0x10] sm:$0xff]  }
   0x5   :  { %v1251_v12 = vld [vmem:[%s1584_s1 + $0x40] sm:$0xff]   ;;  %1173 = vmatpush3.bf16.msra.mxu1 %v1294_v11  ;;  %v1252_v14 = vld [vmem:[%s1584_s1 + $0x48] sm:$0xff]   ;;  %v1253_v16 = vld [vmem:[%s1584_s1 + $0x50] sm:$0xff]  }
   0x6   :  { %358 = vmatpush1.bf16.msra.mxu0 %v1244_v2  ;;  %1174 = vmatprep.subr.bf16.mxu1 %v1303_v9  ;;  %v1297_v17 = vld [vmem:[%s1586_s3 + $0x18] sm:$0xff]   ;;  %v1255_v19 = vld [vmem:[%s1584_s1 + $0x60] ss:$0 sps:$4 sm:$0xff]   ;;  %v1299_v22 = vld [vmem:[%s1586_s3 + $0x28] sm:$0xff]  }
   0x7   :  { %359 = vmatprep.subr.bf16.mxu0 %v1302_v0  ;;  %v1254_v18 = vld [vmem:[%s1584_s1 + $0x58] sm:$0xff]   ;;  %v1298_v20 = vld [vmem:[%s1586_s3 + $0x20] sm:$0xff]   ;;  %v353_v21 = vsel %vm351_vm1, %v1255_v19, 0  ;;  %v1300_v46 = vld [vmem:[%s1586_s3 + $0x30] sm:$0xff]  }
   0x8   :  { %v1256_v23 = vld [vmem:[%s1585_s0] ss:$8 sps:$4 sm:$0xff]   ;;  %v1259_v24 = vld [vmem:[%s1585_s0 + $0x14] ss:$8 sps:$4 sm:$0xff]   ;;  %v1261_v25 = vld [vmem:[%s1585_s0 + $0x10] ss:$8 sps:$4 sm:$0xff]  }
   0x9   :  { %1175 = vmatpush3.bf16.msra.mxu1 %v1295_v13  ;;  %v1262_v26 = vld [vmem:[%s1585_s0 + $0x24] ss:$8 sps:$4 sm:$0xff]   ;;  %v1264_v27 = vld [vmem:[%s1585_s0 + $0x20] ss:$8 sps:$4 sm:$0xff]   ;;  %v1265_v28 = vld [vmem:[%s1585_s0 + $0x34] ss:$8 sps:$4 sm:$0xff]  }
   0xa   :  { %360 = vmatpush1.bf16.msra.mxu0 %v1245_v3  ;;  %1176 = vmatprep.subr.bf16.mxu1 %v1303_v9  ;;  %v1267_v29 = vld [vmem:[%s1585_s0 + $0x30] ss:$8 sps:$4 sm:$0xff]   ;;  %v1268_v30 = vld [vmem:[%s1585_s0 + $0x44] ss:$8 sps:$4 sm:$0xff]   ;;  %v1270_v31 = vld [vmem:[%s1585_s0 + $0x40] ss:$8 sps:$4 sm:$0xff]  }
   0xb   :  { %361 = vmatprep.subr.bf16.mxu0 %v1302_v0  ;;  %v1271_v32 = vld [vmem:[%s1585_s0 + $0x54] ss:$8 sps:$4 sm:$0xff]   ;;  %v1273_v33 = vld [vmem:[%s1585_s0 + $0x50] ss:$8 sps:$4 sm:$0xff]   ;;  %v1274_v34 = vld [vmem:[%s1585_s0 + $0x64] ss:$8 sps:$4 sm:$0xff]  }
   0xc   :  { %v1276_v35 = vld [vmem:[%s1585_s0 + $0x60] ss:$8 sps:$4 sm:$0xff]   ;;  %v1277_v36 = vld [vmem:[%s1585_s0 + $0x74] ss:$8 sps:$4 sm:$0xff]   ;;  %v1279_v37 = vld [vmem:[%s1585_s0 + $0x70] ss:$8 sps:$4 sm:$0xff]  }
   0xd   :  { %1177 = vmatpush3.bf16.msra.mxu1 %v1296_v15  ;;  %v1280_v38 = vld [vmem:[%s1585_s0 + $0x84] ss:$8 sps:$4 sm:$0xff]   ;;  %v1282_v39 = vld [vmem:[%s1585_s0 + $0x80] ss:$8 sps:$4 sm:$0xff]   ;;  %v1283_v40 = vld [vmem:[%s1585_s0 + $0x94] ss:$8 sps:$4 sm:$0xff]  }
   0xe   :  { %362 = vmatpush1.bf16.msra.mxu0 %v1246_v4  ;;  %1178 = vmatprep.subr.bf16.mxu1 %v1303_v9  ;;  %v1285_v41 = vld [vmem:[%s1585_s0 + $0x90] ss:$8 sps:$4 sm:$0xff]   ;;  %v1286_v42 = vld [vmem:[%s1585_s0 + $0xa4] ss:$8 sps:$4 sm:$0xff]   ;;  %v1288_v43 = vld [vmem:[%s1585_s0 + $0xa0] ss:$8 sps:$4 sm:$0xff]  }
   0xf   :  { %363 = vmatprep.subr.bf16.mxu0 %v1302_v0  ;;  %v1289_v44 = vld [vmem:[%s1585_s0 + $0xb4] ss:$8 sps:$4 sm:$0xff]   ;;  %v96_v45 = vld [vmem:[%s1585_s0 + $0xc0] sm:$0xff]  ;;  %v1291_v47 = vld [vmem:[%s1585_s0 + $0xb0] ss:$8 sps:$4 sm:$0xff]  }
  0x10   :  { %v994_v48 = vcombine.high %v96_v45, %v96_v45  ;;  %v1301_v49 = vld [vmem:[%s1586_s3 + $0x38] sm:$0xff]   ;;  %v993_v50 = vcombine.low %v96_v45, %v96_v45  ;;  %v1494_v51 = vld [vmem:[%s1587_s2] ss:$0 sm:$0xff] }
  0x11   :  { %1179 = vmatpush3.bf16.msra.mxu1 %v1297_v17 }
  0x12   :  { %364 = vmatpush1.bf16.msra.mxu0 %v1247_v6  ;;  %1180 = vmatprep.subr.bf16.mxu1 %v1303_v9 }
  0x13   :  { %365 = vmatprep.subr.bf16.mxu0 %v1302_v0 }
  0x15   :  { %1181 = vmatpush3.bf16.msra.mxu1 %v1298_v20 }
  0x16   :  { %366 = vmatpush1.bf16.msra.mxu0 %v1248_v7  ;;  %1182 = vmatprep.subr.bf16.mxu1 %v1303_v9 }
  0x17   :  { %367 = vmatprep.subr.bf16.mxu0 %v1302_v0 }
  0x19   :  { %1183 = vmatpush3.bf16.msra.mxu1 %v1299_v22 }
  0x1a   :  { %368 = vmatpush1.bf16.msra.mxu0 %v1249_v8  ;;  %1184 = vmatprep.subr.bf16.mxu1 %v1303_v9 }
  0x1b   :  { %369 = vmatprep.subr.bf16.mxu0 %v1302_v0 }
  0x1d   :  { %1185 = vmatpush3.bf16.msra.mxu1 %v1300_v46 }
  0x1e   :  { %370 = vmatpush1.bf16.msra.mxu0 %v1250_v10  ;;  %1186 = vmatprep.subr.bf16.mxu1 %v1303_v9 }
  0x1f   :  { %371 = vmatprep.subr.bf16.mxu0 %v1302_v0 }
  0x21   :  { %1187 = vmatpush3.bf16.msra.mxu1 %v1301_v49 }
  0x22   :  { %372 = vmatpush1.bf16.msra.mxu0 %v1251_v12 }
  0x23   :  { %373 = vmatprep.subr.bf16.mxu0 %v1302_v0 }
  0x26   :  { %374 = vmatpush1.bf16.msra.mxu0 %v1252_v14 }
  0x27   :  { %375 = vmatprep.subr.bf16.mxu0 %v1302_v0 }
  0x2a   :  { %376 = vmatpush1.bf16.msra.mxu0 %v1253_v16 }
  0x2b   :  { %377 = vmatprep.subr.bf16.mxu0 %v1302_v0 }
  0x2e   :  { %378 = vmatpush1.bf16.msra.mxu0 %v1254_v18 }
  0x2f   :  { %379 = vmatprep.subr.bf16.mxu0 %v1302_v0 }
  0x32   :  { %380 = vmatpush1.bf16.msra.mxu0 %v353_v21 }
  0x35   :  { %388 = vmatmul.mubr.bf16.vlgmr.msra.gmra.mrb[0].mxu0 %v1256_v23 }
  0x36   :  { %1009 = vmatprep.mubr.msk.bf16.mxu0 %vm311_vm0, %v1259_v24 }
  0x3d   :  { %396 = vmatmul.mubr.bf16.gmra.mrb[4].mxu0 %v1261_v25 }
  0x3e   :  { %1010 = vmatprep.mubr.msk.bf16.mxu0 %vm311_vm0, %v1262_v26 }
  0x45   :  { %404 = vmatmul.mubr.bf16.gmra.mrb[8].mxu0 %v1264_v27 }
  0x46   :  { %1011 = vmatprep.mubr.msk.bf16.mxu0 %vm311_vm0, %v1265_v28 }
  0x4d   :  { %412 = vmatmul.mubr.bf16.gmra.mrb[12].mxu0 %v1267_v29 }
  0x4e   :  { %1012 = vmatprep.mubr.msk.bf16.mxu0 %vm311_vm0, %v1268_v30 }
  0x55   :  { %420 = vmatmul.mubr.bf16.gmra.mrb[16].mxu0 %v1270_v31 }
  0x56   :  { %1013 = vmatprep.mubr.msk.bf16.mxu0 %vm311_vm0, %v1271_v32 }
  0x5d   :  { %428 = vmatmul.mubr.bf16.gmra.mrb[20].mxu0 %v1273_v33 }
  0x5e   :  { %1014 = vmatprep.mubr.msk.bf16.mxu0 %vm311_vm0, %v1274_v34 }
  0x65   :  { %436 = vmatmul.mubr.bf16.gmra.mrb[24].mxu0 %v1276_v35 }
  0x66   :  { %1015 = vmatprep.mubr.msk.bf16.mxu0 %vm311_vm0, %v1277_v36 }
  0x6d   :  { %444 = vmatmul.mubr.bf16.gmra.mrb[28].mxu0 %v1279_v37 }
  0x6e   :  { %1016 = vmatprep.mubr.msk.bf16.mxu0 %vm311_vm0, %v1280_v38 }
  0x75   :  { %452 = vmatmul.mubr.bf16.gmra.mrb[32].mxu0 %v1282_v39 }
  0x76   :  { %1017 = vmatprep.mubr.msk.bf16.mxu0 %vm311_vm0, %v1283_v40 }
  0x7d   :  { %460 = vmatmul.mubr.bf16.gmra.mrb[36].mxu0 %v1285_v41 }
  0x7e   :  { %1018 = vmatprep.mubr.msk.bf16.mxu0 %vm311_vm0, %v1286_v42 }
  0x85   :  { %468 = vmatmul.mubr.bf16.gmra.mrb[40].mxu0 %v1288_v43 }
  0x86   :  { %1019 = vmatprep.mubr.msk.bf16.mxu0 %vm311_vm0, %v1289_v44 }
  0x8d   :  { %476 = vmatmul.mubr.bf16.gmra.mrb[44].mxu0 %v1291_v47 }
  0x8e   :  { %1020 = vmatprep.mubr.msk.bf16.mxu0 %vm311_vm0, %v994_v48 }
  0x95   :  { %484 = vmatmul.mubr.bf16.gmra.mrb[48].mxu0 %v993_v50 }
 0x108   :  { %v389_v52 = vpop.f32.mrb[0].mxu0 }
 0x109   :  { %v576_v53 = vadd.f32 %v1494_v51, %v389_v52  ;;  %v391_v54 = vpop.f32.mrb[1].mxu0 }
 0x10a   :  { %v392_v55 = vpop.f32.mrb[2].mxu0 }
 0x10b   :  { %v577_v56 = vadd.f32 %v1494_v51, %v392_v55  ;;  %v394_v57 = vpop.f32.mrb[3].mxu0  ;;  %v601_v58 = vmax.f32 %v576_v53, 0.0 }
 0x10d   :  { %v602_v59 = vmax.f32 %v577_v56, 0.0 }
 0x10f   :  { %v626_v60 = vpack.c.bf16 %v602_v59, %v601_v58 }
 0x110   :  { %v397_v61 = vpop.f32.mrb[4].mxu0 }
 0x111   :  { %v578_v62 = vadd.f32 %v1494_v51, %v397_v61  ;;  %v399_v63 = vpop.f32.mrb[5].mxu0  ;;  %1189 = vmatmul.mubr.bf16.vlgmr.msra.gmra.mrb[0].mxu1 %v626_v60 }
 0x112   :  { %v400_v0 = vpop.f32.mrb[6].mxu0  ;;  %1192 = vmatprep.mubr.msk.bf16.mxu1 %vm1304_vm2, %v1303_v9 }
 0x113   :  { %v579_v1 = vadd.f32 %v1494_v51, %v400_v0  ;;  %v402_v2 = vpop.f32.mrb[7].mxu0  ;;  %v603_v3 = vmax.f32 %v578_v62, 0.0 }
 0x115   :  { %v604_v4 = vmax.f32 %v579_v1, 0.0 }
 0x117   :  { %v627_v5 = vpack.c.bf16 %v604_v4, %v603_v3 }
 0x118   :  { %v405_v6 = vpop.f32.mrb[8].mxu0 }
 0x119   :  { %v580_v7 = vadd.f32 %v1494_v51, %v405_v6  ;;  %v407_v8 = vpop.f32.mrb[9].mxu0  ;;  %1193 = vmatmul.mubr.bf16.gmra.mrb[4].mxu1 %v627_v5 }
 0x11a   :  { %v408_v10 = vpop.f32.mrb[10].mxu0  ;;  %1196 = vmatprep.mubr.msk.bf16.mxu1 %vm1304_vm2, %v1303_v9 }
 0x11b   :  { %v581_v11 = vadd.f32 %v1494_v51, %v408_v10  ;;  %v410_v12 = vpop.f32.mrb[11].mxu0  ;;  %v605_v13 = vmax.f32 %v580_v7, 0.0 }
 0x11d   :  { %v606_v14 = vmax.f32 %v581_v11, 0.0 }
 0x11f   :  { %v628_v15 = vpack.c.bf16 %v606_v14, %v605_v13 }
 0x120   :  { %v413_v16 = vpop.f32.mrb[12].mxu0 }
 0x121   :  { %v582_v17 = vadd.f32 %v1494_v51, %v413_v16  ;;  %v415_v18 = vpop.f32.mrb[13].mxu0  ;;  %1197 = vmatmul.mubr.bf16.gmra.mrb[8].mxu1 %v628_v15 }
 0x122   :  { %v416_v19 = vpop.f32.mrb[14].mxu0  ;;  %1200 = vmatprep.mubr.msk.bf16.mxu1 %vm1304_vm2, %v1303_v9 }
 0x123   :  { %v583_v20 = vadd.f32 %v1494_v51, %v416_v19  ;;  %v418_v21 = vpop.f32.mrb[15].mxu0  ;;  %v607_v22 = vmax.f32 %v582_v17, 0.0 }
 0x125   :  { %v608_v23 = vmax.f32 %v583_v20, 0.0 }
 0x127   :  { %v629_v24 = vpack.c.bf16 %v608_v23, %v607_v22 }
 0x128   :  { %v421_v25 = vpop.f32.mrb[16].mxu0 }
 0x129   :  { %v584_v26 = vadd.f32 %v1494_v51, %v421_v25  ;;  %v423_v27 = vpop.f32.mrb[17].mxu0  ;;  %1201 = vmatmul.mubr.bf16.gmra.mrb[12].mxu1 %v629_v24 }
 0x12a   :  { %v424_v28 = vpop.f32.mrb[18].mxu0  ;;  %1204 = vmatprep.mubr.msk.bf16.mxu1 %vm1304_vm2, %v1303_v9 }
 0x12b   :  { %v585_v29 = vadd.f32 %v1494_v51, %v424_v28  ;;  %v426_v30 = vpop.f32.mrb[19].mxu0  ;;  %v609_v31 = vmax.f32 %v584_v26, 0.0 }
 0x12d   :  { %v610_v32 = vmax.f32 %v585_v29, 0.0 }
 0x12f   :  { %v630_v33 = vpack.c.bf16 %v610_v32, %v609_v31 }
 0x130   :  { %v429_v34 = vpop.f32.mrb[20].mxu0 }
 0x131   :  { %v586_v35 = vadd.f32 %v1494_v51, %v429_v34  ;;  %v431_v36 = vpop.f32.mrb[21].mxu0  ;;  %1205 = vmatmul.mubr.bf16.gmra.mrb[16].mxu1 %v630_v33 }
 0x132   :  { %v432_v37 = vpop.f32.mrb[22].mxu0  ;;  %1208 = vmatprep.mubr.msk.bf16.mxu1 %vm1304_vm2, %v1303_v9 }
 0x133   :  { %v587_v38 = vadd.f32 %v1494_v51, %v432_v37  ;;  %v434_v39 = vpop.f32.mrb[23].mxu0  ;;  %v611_v40 = vmax.f32 %v586_v35, 0.0 }
 0x135   :  { %v612_v41 = vmax.f32 %v587_v38, 0.0 }
 0x137   :  { %v631_v42 = vpack.c.bf16 %v612_v41, %v611_v40 }
 0x138   :  { %v437_v43 = vpop.f32.mrb[24].mxu0 }
 0x139   :  { %v588_v44 = vadd.f32 %v1494_v51, %v437_v43  ;;  %v439_v45 = vpop.f32.mrb[25].mxu0  ;;  %1209 = vmatmul.mubr.bf16.gmra.mrb[20].mxu1 %v631_v42 }
 0x13a   :  { %v440_v46 = vpop.f32.mrb[26].mxu0  ;;  %1212 = vmatprep.mubr.msk.bf16.mxu1 %vm1304_vm2, %v1303_v9 }
 0x13b   :  { %v589_v47 = vadd.f32 %v1494_v51, %v440_v46  ;;  %v442_v48 = vpop.f32.mrb[27].mxu0  ;;  %v613_v49 = vmax.f32 %v588_v44, 0.0 }
 0x13d   :  { %v614_v50 = vmax.f32 %v589_v47, 0.0 }
 0x13f   :  { %v632_v52 = vpack.c.bf16 %v614_v50, %v613_v49 }
 0x140   :  { %v445_v53 = vpop.f32.mrb[28].mxu0 }
 0x141   :  { %v590_v54 = vadd.f32 %v1494_v51, %v445_v53  ;;  %v447_v55 = vpop.f32.mrb[29].mxu0  ;;  %1213 = vmatmul.mubr.bf16.gmra.mrb[24].mxu1 %v632_v52 }
 0x142   :  { %v448_v56 = vpop.f32.mrb[30].mxu0  ;;  %1216 = vmatprep.mubr.msk.bf16.mxu1 %vm1304_vm2, %v1303_v9 }
 0x143   :  { %v591_v57 = vadd.f32 %v1494_v51, %v448_v56  ;;  %v450_v58 = vpop.f32.mrb[31].mxu0  ;;  %v615_v59 = vmax.f32 %v590_v54, 0.0 }
 0x145   :  { %v616_v60 = vmax.f32 %v591_v57, 0.0 }
 0x147   :  { %v633_v61 = vpack.c.bf16 %v616_v60, %v615_v59 }
 0x148   :  { %v453_v62 = vpop.f32.mrb[32].mxu0 }
 0x149   :  { %v592_v63 = vadd.f32 %v1494_v51, %v453_v62  ;;  %v455_v0 = vpop.f32.mrb[33].mxu0  ;;  %1217 = vmatmul.mubr.bf16.gmra.mrb[28].mxu1 %v633_v61 }
 0x14a   :  { %v456_v1 = vpop.f32.mrb[34].mxu0  ;;  %1220 = vmatprep.mubr.msk.bf16.mxu1 %vm1304_vm2, %v1303_v9 }
 0x14b   :  { %v593_v2 = vadd.f32 %v1494_v51, %v456_v1  ;;  %v458_v3 = vpop.f32.mrb[35].mxu0  ;;  %v617_v4 = vmax.f32 %v592_v63, 0.0 }
 0x14d   :  { %v618_v5 = vmax.f32 %v593_v2, 0.0 }
 0x14f   :  { %v634_v6 = vpack.c.bf16 %v618_v5, %v617_v4 }
 0x150   :  { %v461_v7 = vpop.f32.mrb[36].mxu0 }
 0x151   :  { %v594_v8 = vadd.f32 %v1494_v51, %v461_v7  ;;  %v463_v10 = vpop.f32.mrb[37].mxu0  ;;  %1221 = vmatmul.mubr.bf16.gmra.mrb[32].mxu1 %v634_v6 }
 0x152   :  { %v464_v11 = vpop.f32.mrb[38].mxu0  ;;  %1224 = vmatprep.mubr.msk.bf16.mxu1 %vm1304_vm2, %v1303_v9 }
 0x153   :  { %v595_v12 = vadd.f32 %v1494_v51, %v464_v11  ;;  %v466_v13 = vpop.f32.mrb[39].mxu0  ;;  %v619_v14 = vmax.f32 %v594_v8, 0.0 }
 0x155   :  { %v620_v15 = vmax.f32 %v595_v12, 0.0 }
 0x157   :  { %v635_v16 = vpack.c.bf16 %v620_v15, %v619_v14 }
 0x158   :  { %v469_v17 = vpop.f32.mrb[40].mxu0 }
 0x159   :  { %v596_v18 = vadd.f32 %v1494_v51, %v469_v17  ;;  %v471_v19 = vpop.f32.mrb[41].mxu0  ;;  %1225 = vmatmul.mubr.bf16.gmra.mrb[36].mxu1 %v635_v16 }
 0x15a   :  { %v472_v20 = vpop.f32.mrb[42].mxu0  ;;  %1228 = vmatprep.mubr.msk.bf16.mxu1 %vm1304_vm2, %v1303_v9 }
 0x15b   :  { %v597_v21 = vadd.f32 %v1494_v51, %v472_v20  ;;  %v474_v22 = vpop.f32.mrb[43].mxu0  ;;  %v621_v23 = vmax.f32 %v596_v18, 0.0 }
 0x15d   :  { %v622_v24 = vmax.f32 %v597_v21, 0.0 }
 0x15f   :  { %v636_v25 = vpack.c.bf16 %v622_v24, %v621_v23 }
 0x160   :  { %v477_v26 = vpop.f32.mrb[44].mxu0 }
 0x161   :  { %v598_v27 = vadd.f32 %v1494_v51, %v477_v26  ;;  %v479_v28 = vpop.f32.mrb[45].mxu0  ;;  %1229 = vmatmul.mubr.bf16.gmra.mrb[40].mxu1 %v636_v25 }
 0x162   :  { %v480_v29 = vpop.f32.mrb[46].mxu0  ;;  %1232 = vmatprep.mubr.msk.bf16.mxu1 %vm1304_vm2, %v1303_v9 }
 0x163   :  { %v599_v30 = vadd.f32 %v1494_v51, %v480_v29  ;;  %v482_v31 = vpop.f32.mrb[47].mxu0  ;;  %v623_v32 = vmax.f32 %v598_v27, 0.0 }
 0x165   :  { %v624_v33 = vmax.f32 %v599_v30, 0.0 }
 0x167   :  { %v637_v34 = vpack.c.bf16 %v624_v33, %v623_v32 }
 0x168   :  { %v485_v35 = vpop.f32.mrb[48].mxu0 }
 0x169   :  { %v600_v36 = vadd.f32 %v1494_v51, %v485_v35  ;;  %v487_v37 = vpop.f32.mrb[49].mxu0  ;;  %1233 = vmatmul.mubr.bf16.gmra.mrb[44].mxu1 %v637_v34 }
 0x16a   :  { %v488_v38 = vpop.f32.mrb[50].mxu0  ;;  %1236 = vmatprep.mubr.msk.bf16.mxu1 %vm1304_vm2, %v1303_v9 }
 0x16b   :  { %v625_v39 = vmax.f32 %v600_v36, 0.0  ;;  %v489_v40 = vpop.f32.mrb[51].mxu0 }
 0x16d   :  { %v638_v41 = vpack.c.bf16 %v625_v39, %v625_v39 }
 0x171   :  { %1237 = vmatmul.mubr.bf16.gmra.mrb[48].mxu1 %v638_v41 }
 0x1e4   :  { %v737_v42 = vpop.f32.mrb[0].mxu1 }
 0x1e5   :  { %v1190_v43 = vpop.f32.mrb[1].mxu1 }
 0x1e6   :  { %v740_v44 = vpop.f32.mrb[2].mxu1 }
 0x1e7   :  { %v1083_v45 = vpack.c.bf16 %v740_v44, %v737_v42  ;;  %v1191_v46 = vpop.f32.mrb[3].mxu1 }
 0x1e9   :  { %1084 = vst [vmem:[%s1588_s4] sm:$0xff] %v1083_v45  }
 0x1ec   :  { %v745_v51 = vpop.f32.mrb[4].mxu1 }
 0x1ed   :  { %v1194_v47 = vpop.f32.mrb[5].mxu1 }
 0x1ee   :  { %v748_v48 = vpop.f32.mrb[6].mxu1 }
 0x1ef   :  { %v1088_v49 = vpack.c.bf16 %v748_v48, %v745_v51  ;;  %v1195_v50 = vpop.f32.mrb[7].mxu1 }
 0x1f1   :  { %1140 = vst [vmem:[%s1588_s4 + $0x8] sm:$0xff] %v1088_v49  }
 0x1f4   :  { %v753_v9 = vpop.f32.mrb[8].mxu1 }
 0x1f5   :  { %v1198_v52 = vpop.f32.mrb[9].mxu1 }
 0x1f6   :  { %v756_v53 = vpop.f32.mrb[10].mxu1 }
 0x1f7   :  { %v1093_v54 = vpack.c.bf16 %v756_v53, %v753_v9  ;;  %v1199_v55 = vpop.f32.mrb[11].mxu1 }
 0x1f9   :  { %1141 = vst [vmem:[%s1588_s4 + $0x10] sm:$0xff] %v1093_v54  }
 0x1fc   :  { %v761_v56 = vpop.f32.mrb[12].mxu1 }
 0x1fd   :  { %v1202_v57 = vpop.f32.mrb[13].mxu1 }
 0x1fe   :  { %v764_v58 = vpop.f32.mrb[14].mxu1 }
 0x1ff   :  { %v1098_v59 = vpack.c.bf16 %v764_v58, %v761_v56  ;;  %v1203_v60 = vpop.f32.mrb[15].mxu1 }
 0x201   :  { %1142 = vst [vmem:[%s1588_s4 + $0x18] sm:$0xff] %v1098_v59  }
 0x204   :  { %v769_v61 = vpop.f32.mrb[16].mxu1 }
 0x205   :  { %v1206_v62 = vpop.f32.mrb[17].mxu1 }
 0x206   :  { %v772_v63 = vpop.f32.mrb[18].mxu1 }
 0x207   :  { %v1103_v0 = vpack.c.bf16 %v772_v63, %v769_v61  ;;  %v1207_v1 = vpop.f32.mrb[19].mxu1 }
 0x209   :  { %1143 = vst [vmem:[%s1588_s4 + $0x20] sm:$0xff] %v1103_v0  }
 0x20c   :  { %v777_v2 = vpop.f32.mrb[20].mxu1 }
 0x20d   :  { %v1210_v3 = vpop.f32.mrb[21].mxu1 }
 0x20e   :  { %v780_v4 = vpop.f32.mrb[22].mxu1 }
 0x20f   :  { %v1108_v5 = vpack.c.bf16 %v780_v4, %v777_v2  ;;  %v1211_v6 = vpop.f32.mrb[23].mxu1 }
 0x211   :  { %1144 = vst [vmem:[%s1588_s4 + $0x28] sm:$0xff] %v1108_v5  }
 0x214   :  { %v785_v7 = vpop.f32.mrb[24].mxu1 }
 0x215   :  { %v1214_v8 = vpop.f32.mrb[25].mxu1 }
 0x216   :  { %v788_v10 = vpop.f32.mrb[26].mxu1 }
 0x217   :  { %v1113_v11 = vpack.c.bf16 %v788_v10, %v785_v7  ;;  %v1215_v12 = vpop.f32.mrb[27].mxu1 }
 0x219   :  { %1145 = vst [vmem:[%s1588_s4 + $0x30] sm:$0xff] %v1113_v11  }
 0x21c   :  { %v793_v13 = vpop.f32.mrb[28].mxu1 }
 0x21d   :  { %v1218_v14 = vpop.f32.mrb[29].mxu1 }
 0x21e   :  { %v796_v15 = vpop.f32.mrb[30].mxu1 }
 0x21f   :  { %v1118_v16 = vpack.c.bf16 %v796_v15, %v793_v13  ;;  %v1219_v17 = vpop.f32.mrb[31].mxu1 }
 0x221   :  { %1146 = vst [vmem:[%s1588_s4 + $0x38] sm:$0xff] %v1118_v16  }
 0x224   :  { %v801_v18 = vpop.f32.mrb[32].mxu1 }
 0x225   :  { %v1222_v19 = vpop.f32.mrb[33].mxu1 }
 0x226   :  { %v804_v20 = vpop.f32.mrb[34].mxu1 }
 0x227   :  { %v1123_v21 = vpack.c.bf16 %v804_v20, %v801_v18  ;;  %v1223_v22 = vpop.f32.mrb[35].mxu1 }
 0x229   :  { %1147 = vst [vmem:[%s1588_s4 + $0x40] sm:$0xff] %v1123_v21  }
 0x22c   :  { %v809_v23 = vpop.f32.mrb[36].mxu1 }
 0x22d   :  { %v1226_v24 = vpop.f32.mrb[37].mxu1 }
 0x22e   :  { %v812_v25 = vpop.f32.mrb[38].mxu1 }
 0x22f   :  { %v1128_v26 = vpack.c.bf16 %v812_v25, %v809_v23  ;;  %v1227_v27 = vpop.f32.mrb[39].mxu1 }
 0x231   :  { %1148 = vst [vmem:[%s1588_s4 + $0x48] sm:$0xff] %v1128_v26  }
 0x234   :  { %v817_v28 = vpop.f32.mrb[40].mxu1 }
 0x235   :  { %v1230_v29 = vpop.f32.mrb[41].mxu1 }
 0x236   :  { %v820_v30 = vpop.f32.mrb[42].mxu1 }
 0x237   :  { %v1133_v31 = vpack.c.bf16 %v820_v30, %v817_v28  ;;  %v1231_v32 = vpop.f32.mrb[43].mxu1 }
 0x239   :  { %1149 = vst [vmem:[%s1588_s4 + $0x50] sm:$0xff] %v1133_v31  }
 0x23c   :  { %v825_v33 = vpop.f32.mrb[44].mxu1 }
 0x23d   :  { %v1234_v34 = vpop.f32.mrb[45].mxu1 }
 0x23e   :  { %v828_v35 = vpop.f32.mrb[46].mxu1 }
 0x23f   :  { %v1138_v36 = vpack.c.bf16 %v828_v35, %v825_v33  ;;  %v1235_v37 = vpop.f32.mrb[47].mxu1 }
 0x241   :  { %1150 = vst [vmem:[%s1588_s4 + $0x58] sm:$0xff] %v1138_v36  }
 0x244   :  { %v833_v38 = vpop.f32.mrb[48].mxu1 }
 0x245   :  { %v1079_v39 = vpack.c.bf16 %v833_v38, %v833_v38  ;;  %v1238_v40 = vpop.f32.mrb[49].mxu1 }
 0x246   :  { %v836_v41 = vpop.f32.mrb[50].mxu1 }
 0x247   :  { %964 = vst [vmem:[%s1588_s4 + $0x60] sm:$0xf] %v1079_v39  ;;  %v1239_v42 = vpop.f32.mrb[51].mxu1 }

</bundles_post_ra>
